<compile_context>
chip_gen: v7x
topology: tpu7x:2x2x1
jax: 0.10.0
libtpu: 0.0.40
codegen_flags: <defaults>
</compile_context>

<pallas_src>
import math

import jax
import jax.numpy as jnp
from jax.experimental import pallas as pl
from jax.experimental.pallas import tpu as pltpu


# ---------------------------------------------------------------------------
# Kernels
# ---------------------------------------------------------------------------

def _gwl_matmul_kernel(x_ref, s_ref, b_ref, o_ref):
    # x_ref: (TB, C*D)   s_ref: (C*D, C)   b_ref: (1, C)   o_ref: (TB, C)
    # Single MXU matmul does the elementwise multiply AND the per-class
    # reduction (S is block-diagonal), accumulating in f32.  No product temp.
    acc = jnp.dot(x_ref[...], s_ref[...], preferred_element_type=jnp.float32)
    o_ref[...] = (acc + b_ref[...].astype(jnp.float32)).astype(o_ref.dtype)


def _gwl_elementwise_kernel(x_ref, w_ref, b_ref, o_ref):
    # x_ref: (TB, C, D)   w_ref: (1, C, D)   b_ref: (1, C)   o_ref: (TB, C)
    # Fallback path (only used when the folded weight matrix would be too big
    # for VMEM, i.e. D is large and already lane-dense).
    s = jnp.sum(w_ref[...] * x_ref[...], axis=-1, dtype=jnp.float32)
    o_ref[...] = (s + b_ref[...].astype(jnp.float32)).astype(o_ref.dtype)


# ---------------------------------------------------------------------------
# Tiling helpers
# ---------------------------------------------------------------------------

def _round_up(v, m):
    return -(-v // m) * m


def _vmem_capacity_bytes():
    try:
        return int(pltpu.get_tpu_info().vmem_capacity_bytes)
    except Exception:
        return 64 << 20  # conservative per-TensorCore floor (v7x)


def _choose_block_batch(B, row_bytes, itemsize):
    """Batch rows per grid step.

    ~2 MiB x-slab per step already sits at >=85% of the HBM roofline while
    keeping the double-buffered footprint small on v7x's 64 MiB VMEM.  TB is
    rounded to 128 when possible (covers the sublane pack factor of every
    dtype: 8 f32 / 16 bf16 / 32 int8-fp8); when the whole batch fits in one
    slab we still split it into two grid steps so both v7x TensorCores get
    work on the "parallel" batch axis.
    """
    pack = max(8, 32 // max(1, itemsize))
    target = 2 << 20
    tb = max(1, target // max(1, row_bytes))
    if tb >= B:
        if B >= 256:
            half = _round_up(_round_up(B, 2) // 2, 128)
            return min(half, _round_up(B, pack))
        # Tiny batch: one grid step; rows are rounded up to the pack factor
        # (OOB rows read garbage, their output rows are masked on write).
        return _round_up(B, pack)
    if tb >= 128:
        return (tb // 128) * 128
    return max(pack, (tb // pack) * pack)


def _resolve_tb(B, row_bytes, itemsize, block_batch):
    if block_batch is None:
        return _choose_block_batch(B, row_bytes, itemsize)
    return min(_round_up(int(block_batch), 8), _round_up(B, 8))


def _vmem_limit(vmem_need):
    cap = _vmem_capacity_bytes()
    return int(min(max(vmem_need + (4 << 20), 16 << 20), (cap * 3) // 4))


# ---------------------------------------------------------------------------
# Paths
# ---------------------------------------------------------------------------

def _gwl_matmul_path(x, W, b, block_batch):
    B, C, D = x.shape
    CD = C * D
    itemsize = jnp.dtype(x.dtype).itemsize

    # Free, contiguous reshape: the lane axis becomes C*D (lane-dense whenever
    # C*D is a multiple of 128, e.g. the C=8, D=32 demo -> 256 lanes).
    x_flat = x.reshape(B, CD)

    # Fold W into the block-diagonal segment matrix S[(c*D+d), c] = W[0,c,d].
    w_rows = W.reshape(C, D).astype(x.dtype)
    eye = jnp.eye(C, dtype=x.dtype)
    S = (w_rows[:, :, None] * eye[:, None, :]).reshape(CD, C)
    b2 = b.reshape(1, C)

    tb = _resolve_tb(B, CD * itemsize, itemsize, block_batch)
    grid_b = pl.cdiv(B, tb)  # ragged tail handled by masked OOB output writes

    x_blk = tb * CD * itemsize
    s_blk = CD * C * itemsize
    b_blk = C * jnp.dtype(b.dtype).itemsize
    o_blk = tb * C * itemsize
    vmem_need = 2 * (x_blk + s_blk + b_blk + o_blk) + tb * C * 4

    cost = pl.CostEstimate(
        flops=2 * B * CD * C,
        bytes_accessed=(x_flat.size * itemsize + S.size * itemsize
                        + b2.size * jnp.dtype(b.dtype).itemsize
                        + B * C * itemsize),
        transcendentals=0,
    )

    return pl.pallas_call(
        _gwl_matmul_kernel,
        out_shape=jax.ShapeDtypeStruct((B, C), x.dtype),
        grid_spec=pltpu.PrefetchScalarGridSpec(
            num_scalar_prefetch=0,
            grid=(grid_b,),
            in_specs=[
                pl.BlockSpec((tb, CD), lambda i: (i, 0)),  # x rows per step
                pl.BlockSpec((CD, C), lambda i: (0, 0)),   # folded W (resident)
                pl.BlockSpec((1, C), lambda i: (0, 0)),    # bias (resident)
            ],
            out_specs=pl.BlockSpec((tb, C), lambda i: (i, 0)),
        ),
        compiler_params=pltpu.CompilerParams(
            # Plain "parallel" is sufficient for megacore sharding of the
            # batch axis; CORE_PARALLEL left as a follow-up experiment.
            dimension_semantics=("parallel",),
            vmem_limit_bytes=_vmem_limit(vmem_need),
        ),
        cost_estimate=cost,
    )(x_flat, S, b2)


def _gwl_elementwise_path(x, W, b, block_batch):
    B, C, D = x.shape
    itemsize = jnp.dtype(x.dtype).itemsize

    tb = _resolve_tb(B, C * D * itemsize, itemsize, block_batch)
    grid_b = pl.cdiv(B, tb)

    x_blk = tb * C * D * itemsize
    w_blk = C * D * jnp.dtype(W.dtype).itemsize
    b_blk = C * jnp.dtype(b.dtype).itemsize
    o_blk = tb * C * itemsize
    vmem_need = 2 * (x_blk + w_blk + b_blk + o_blk) + tb * C * D * 4 + tb * C * 4

    cost = pl.CostEstimate(
        flops=2 * B * C * D,
        bytes_accessed=(x.size * itemsize + W.size * jnp.dtype(W.dtype).itemsize
                        + b.size * jnp.dtype(b.dtype).itemsize
                        + B * C * itemsize),
        transcendentals=0,
    )

    return pl.pallas_call(
        _gwl_elementwise_kernel,
        out_shape=jax.ShapeDtypeStruct((B, C), x.dtype),
        grid_spec=pltpu.PrefetchScalarGridSpec(
            num_scalar_prefetch=0,
            grid=(grid_b,),
            in_specs=[
                pl.BlockSpec((tb, C, D), lambda i: (i, 0, 0)),  # x rows / step
                pl.BlockSpec((1, C, D), lambda i: (0, 0, 0)),   # W (resident)
                pl.BlockSpec((1, C), lambda i: (0, 0)),         # bias (resident)
            ],
            out_specs=pl.BlockSpec((tb, C), lambda i: (i, 0)),
        ),
        compiler_params=pltpu.CompilerParams(
            dimension_semantics=("parallel",),
            vmem_limit_bytes=_vmem_limit(vmem_need),
        ),
        cost_estimate=cost,
    )(x, W, b)


# ---------------------------------------------------------------------------
# Public wrapper
# ---------------------------------------------------------------------------

def group_wise_linear(x, W, b, *, path=None, block_batch=None):
    """x: (B, C, D), W: (1, C, D), b: (1, C) -> (B, C). bias=True semantics."""
    B, C, D = x.shape
    assert W.shape == (1, C, D)
    assert b.shape == (1, C)
    itemsize = jnp.dtype(x.dtype).itemsize
    if path is None:
        # Folded-weight MXU path unless the (C*D, C) folded weight would not
        # fit comfortably in (double-buffered) VMEM.
        path = "matmul" if C * D * C * itemsize <= (8 << 20) else "elementwise"
    if path == "matmul":
        return _gwl_matmul_path(x, W, b, block_batch)
    return _gwl_elementwise_path(x, W, b, block_batch)


# ---------------------------------------------------------------------------
# Demo / correctness checks
# ---------------------------------------------------------------------------

if __name__ == "__main__":
    num_class = 8
    hidden_dim = 32

    key = jax.random.PRNGKey(0)
    kW, kb, kx1, kx2, kx3 = jax.random.split(key, 5)

    # Parameter init matching reset_parameters(): uniform(-stdv, stdv),
    # stdv = 1/sqrt(hidden_dim).
    stdv = 1.0 / math.sqrt(hidden_dim)
    W = jax.random.uniform(
        kW, (1, num_class, hidden_dim), jnp.float32, minval=-stdv, maxval=stdv
    )
    b = jax.random.uniform(
        kb, (1, num_class), jnp.float32, minval=-stdv, maxval=stdv
    )

    def reference(x):
        return jnp.sum(W * x, axis=-1) + b

    # Matmul-path tolerances are kept modest to remain robust if the MXU runs
    # the f32 product at bf16-pass precision on some generations (still far
    # tighter than any algorithmic bug would produce).
    MM_TOL = dict(atol=1e-2, rtol=1e-2)

    # Case 1: tiny batch -> single block (rounded up to 8 rows, tail masked).
    x1 = jax.random.normal(kx1, (2, num_class, hidden_dim), jnp.float32)
    out1 = jax.block_until_ready(group_wise_linear(x1, W, b))
    assert out1.shape == (2, num_class)
    assert jnp.allclose(out1, reference(x1), **MM_TOL)

    # Case 2: ragged tail (B % TB != 0) with NO wrapper-side padding of x.
    x2 = jax.random.normal(kx2, (20, num_class, hidden_dim), jnp.float32)
    out2 = jax.block_until_ready(group_wise_linear(x2, W, b, block_batch=8))
    assert out2.shape == (20, num_class)
    assert jnp.allclose(out2, reference(x2), **MM_TOL)

    # Case 3: default tiling picks two grid steps (megacore-friendly); also
    # exercise the elementwise fallback path on the same data.
    x3 = jax.random.normal(kx3, (512, num_class, hidden_dim), jnp.float32)
    ref3 = reference(x3)
    out3 = jax.block_until_ready(group_wise_linear(x3, W, b))
    assert out3.shape == (512, num_class)
    assert jnp.allclose(out3, ref3, **MM_TOL)
    out3_ew = jax.block_until_ready(
        group_wise_linear(x3, W, b, path="elementwise")
    )
    assert jnp.allclose(out3_ew, ref3, atol=1e-4, rtol=1e-4)

    print("KERNEL_OK")
</pallas_src>

<mosaic_0001>
module attributes {stable_mosaic.version = 11 : i64} {
  func.func @_gwl_matmul_kernel(%arg0: i32, %arg1: memref<8x256xf32, #tpu.memory_space<vmem>>, %arg2: memref<256x8xf32, #tpu.memory_space<vmem>>, %arg3: memref<1x8xf32, #tpu.memory_space<vmem>>, %arg4: memref<8x8xf32, #tpu.memory_space<vmem>>) attributes {dimension_semantics = [#tpu.dimension_semantics<parallel>], iteration_bounds = array<i64: 1>, scalar_prefetch = 0 : i64, scratch_operands = 0 : i64, tpu.core_type = #tpu.core_type<tc>, window_params = [{transform_indices = @transform_0, window_bounds = array<i64: 8, 256>}, {pipeline_mode = #tpu.pipeline_mode<synchronous>, transform_indices = @transform_1, window_bounds = array<i64: 256, 8>}, {pipeline_mode = #tpu.pipeline_mode<synchronous>, transform_indices = @transform_2, window_bounds = array<i64: 1, 8>}, {transform_indices = @transform_3, window_bounds = array<i64: 8, 8>}]} {
    %c0 = arith.constant 0 : index
    %c0_0 = arith.constant 0 : index
    %0 = vector.load %arg1[%c0, %c0_0] : memref<8x256xf32, #tpu.memory_space<vmem>>, vector<8x256xf32>
    %c0_1 = arith.constant 0 : index
    %c0_2 = arith.constant 0 : index
    %1 = vector.load %arg2[%c0_1, %c0_2] : memref<256x8xf32, #tpu.memory_space<vmem>>, vector<256x8xf32>
    %cst = arith.constant dense<0.000000e+00> : vector<8x8xf32>
    %2 = tpu.matmul %0, %1, %cst {dimension_numbers = #tpu.dot_dimension_numbers<[1], [0], [0], [1], [0, 0, 1, 1], [], []>} : vector<8x256xf32>, vector<256x8xf32>, vector<8x8xf32> -> vector<8x8xf32>
    %c0_3 = arith.constant 0 : index
    %c0_4 = arith.constant 0 : index
    %3 = vector.load %arg3[%c0_3, %c0_4] : memref<1x8xf32, #tpu.memory_space<vmem>>, vector<1x8xf32>
    %4 = vector.broadcast %3 : vector<1x8xf32> to vector<8x8xf32>
    %5 = arith.addf %2, %4 : vector<8x8xf32>
    %c0_5 = arith.constant 0 : index
    %c0_6 = arith.constant 0 : index
    %6 = vector.load %arg4[%c0_5, %c0_6] : memref<8x8xf32, #tpu.memory_space<vmem>>, vector<8x8xf32>
    tpu.vector_store %arg4[%c0_5, %c0_6], %5 {strides = array<i32>} : memref<8x8xf32, #tpu.memory_space<vmem>>, vector<8x8xf32>,
    return
  }
  func.func @transform_0(%arg0: i32) -> (i32, i32) {
    %c0_i32 = arith.constant 0 : i32
    %c0_i32_0 = arith.constant 0 : i32
    return %arg0, %c0_i32 : i32, i32
  }
  func.func @transform_1(%arg0: i32) -> (i32, i32) {
    %c0_i32 = arith.constant 0 : i32
    %c0_i32_0 = arith.constant 0 : i32
    %c0_i32_1 = arith.constant 0 : i32
    return %c0_i32, %c0_i32_0 : i32, i32
  }
  func.func @transform_2(%arg0: i32) -> (i32, i32) {
    %c0_i32 = arith.constant 0 : i32
    %c0_i32_0 = arith.constant 0 : i32
    %c0_i32_1 = arith.constant 0 : i32
    return %c0_i32, %c0_i32_0 : i32, i32
  }
  func.func @transform_3(%arg0: i32) -> (i32, i32) {
    %c0_i32 = arith.constant 0 : i32
    %c0_i32_0 = arith.constant 0 : i32
    return %arg0, %c0_i32 : i32, i32
  }
}

</mosaic_0001>

<bundles_post_ra>
// kernel: tpu_custom_call.1
= control target key start
LH: loop header
LB: loop body
LE: loop exit
PB: predicated region body
PF: predicated region fallthrough
CT: control target
= control target key end

     0   :  { %8 = vsyncpa [#allocation3], 0  ;;  %vm152_vm0 = vcmask 64512   ;;  %s410_s0 = inlined_call_operand.vmem [shape: f32[2,256], index: 0, kind: input, shape index: {}]   ;;  %s411_s1 = inlined_call_operand.vmem [shape: f32[256,8], index: 1, kind: input, shape index: {}]   ;;  %s412_s2 = inlined_call_operand.vmem [shape: f32[1,8], index: 2, kind: input, shape index: {}]   ;;  %s413_s3 = inlined_call_operand.hbm [shape: f32[2,8], index: 3, kind: output, shape index: {}]  }
   0x1   :  { %v35_v0 = vld [vmem:[%s411_s1 + $0x80] sm:$0xff]  ;;  %v36_v1 = vld [vmem:[%s411_s1 + $0x88] sm:$0xff]  ;;  %v37_v5 = vld [vmem:[%s411_s1 + $0x90] sm:$0xff] }
   0x2   :  { %v206_v2 = vpack.c.bf16 %v36_v1, %v35_v0  ;;  %v19_v3 = vld [vmem:[%s411_s1] sm:$0xff]  ;;  %v20_v4 = vld [vmem:[%s411_s1 + $0x8] sm:$0xff]  ;;  %v38_v7 = vld [vmem:[%s411_s1 + $0x98] sm:$0xff] }
   0x3   :  { %v208_v6 = vpack.c.bf16 %v20_v4, %v19_v3  ;;  %v21_v8 = vld [vmem:[%s411_s1 + $0x10] sm:$0xff]  ;;  %v22_v9 = vld [vmem:[%s411_s1 + $0x18] sm:$0xff]  ;;  %v210_v10 = vpack.c.bf16 %v38_v7, %v37_v5  ;;  %v39_v11 = vld [vmem:[%s411_s1 + $0xa0] sm:$0xff] }
   0x4   :  { %207 = vmatprep.subr.bf16.mxu0 %v206_v2  ;;  %v40_v12 = vld [vmem:[%s411_s1 + $0xa8] sm:$0xff]  ;;  %v212_v13 = vpack.c.bf16 %v22_v9, %v21_v8  ;;  %v23_v15 = vld [vmem:[%s411_s1 + $0x20] sm:$0xff]  ;;  %v41_v17 = vld [vmem:[%s411_s1 + $0xb0] sm:$0xff] }
   0x5   :  { %209 = vmatpush3.bf16.msra.mxu0 %v208_v6  ;;  %v214_v14 = vpack.c.bf16 %v40_v12, %v39_v11  ;;  %v24_v16 = vld [vmem:[%s411_s1 + $0x28] sm:$0xff]  ;;  %v42_v18 = vld [vmem:[%s411_s1 + $0xb8] sm:$0xff]  ;;  %v25_v21 = vld [vmem:[%s411_s1 + $0x30] sm:$0xff] }
   0x6   :  { %211 = vmatprep.subr.bf16.mxu0 %v210_v10  ;;  %v216_v19 = vpack.c.bf16 %v24_v16, %v23_v15  ;;  %v218_v20 = vpack.c.bf16 %v42_v18, %v41_v17  ;;  %v26_v22 = vld [vmem:[%s411_s1 + $0x38] sm:$0xff]  ;;  %v43_v23 = vld [vmem:[%s411_s1 + $0xc0] sm:$0xff]  ;;  %v44_v24 = vld [vmem:[%s411_s1 + $0xc8] sm:$0xff] }
   0x7   :  { %v220_v25 = vpack.c.bf16 %v26_v22, %v25_v21  ;;  %v244_v26 = vld.sshfl [vmem:[%s410_s0] sm:$0xff pattern:$0x76325410]  ;;  %v245_v27 = vld.sshfl [vmem:[%s410_s0 + $0x8] sm:$0xff pattern:$0x76325410]  ;;  %v222_v28 = vpack.c.bf16 %v44_v24, %v43_v23 }
   0x8   :  { %v27_v29 = vld [vmem:[%s411_s1 + $0x40] sm:$0xff]  ;;  %v28_v30 = vld [vmem:[%s411_s1 + $0x48] sm:$0xff]  ;;  %v45_v31 = vld [vmem:[%s411_s1 + $0xd0] sm:$0xff]  ;;  %v79_v34 = vcombine.high %v244_v26, %v245_v27  ;;  %v78_v51 = vcombine.low %v244_v26, %v245_v27 }
   0x9   :  { %213 = vmatpush3.bf16.msra.mxu0 %v212_v13  ;;  %v46_v32 = vld [vmem:[%s411_s1 + $0xd8] sm:$0xff]  ;;  %v224_v33 = vpack.c.bf16 %v28_v30, %v27_v29  ;;  %v29_v36 = vld [vmem:[%s411_s1 + $0x50] sm:$0xff]  ;;  %v47_v38 = vld [vmem:[%s411_s1 + $0xe0] sm:$0xff] }
   0xa   :  { %215 = vmatprep.subr.bf16.mxu0 %v214_v14  ;;  %v226_v35 = vpack.c.bf16 %v46_v32, %v45_v31  ;;  %v30_v37 = vld [vmem:[%s411_s1 + $0x58] sm:$0xff]  ;;  %v48_v39 = vld [vmem:[%s411_s1 + $0xe8] sm:$0xff]  ;;  %146 = vmatprep.mubr.f32.mxu0 %v79_v34  ;;  %v31_v42 = vld [vmem:[%s411_s1 + $0x60] sm:$0xff] }
   0xb   :  { %v228_v40 = vpack.c.bf16 %v30_v37, %v29_v36  ;;  %v230_v41 = vpack.c.bf16 %v48_v39, %v47_v38  ;;  %v32_v43 = vld [vmem:[%s411_s1 + $0x68] sm:$0xff]  ;;  %v49_v44 = vld [vmem:[%s411_s1 + $0xf0] sm:$0xff]  ;;  %v50_v45 = vld [vmem:[%s411_s1 + $0xf8] sm:$0xff] }
   0xc   :  { %v232_v46 = vpack.c.bf16 %v32_v43, %v31_v42  ;;  %v234_v47 = vpack.c.bf16 %v50_v45, %v49_v44  ;;  %v33_v48 = vld [vmem:[%s411_s1 + $0x70] sm:$0xff]  ;;  %v34_v49 = vld [vmem:[%s411_s1 + $0x78] sm:$0xff]  ;;  %v170_v53 = vld [vmem:[%s412_s2] ss:$0 sm:$0xff] }
   0xd   :  { %217 = vmatpush3.bf16.msra.mxu0 %v216_v19  ;;  %v236_v50 = vpack.c.bf16 %v34_v49, %v33_v48 }
   0xe   :  { %219 = vmatprep.subr.bf16.mxu0 %v218_v20 }
  0x11   :  { %221 = vmatpush3.bf16.msra.mxu0 %v220_v25 }
  0x12   :  { %223 = vmatprep.subr.bf16.mxu0 %v222_v28 }
  0x15   :  { %225 = vmatpush3.bf16.msra.mxu0 %v224_v33 }
  0x16   :  { %227 = vmatprep.subr.bf16.mxu0 %v226_v35 }
  0x19   :  { %229 = vmatpush3.bf16.msra.mxu0 %v228_v40 }
  0x1a   :  { %231 = vmatprep.subr.bf16.mxu0 %v230_v41 }
  0x1d   :  { %233 = vmatpush3.bf16.msra.mxu0 %v232_v46 }
  0x1e   :  { %235 = vmatprep.subr.bf16.mxu0 %v234_v47 }
  0x21   :  { %237 = vmatpush3.bf16.msra.mxu0 %v236_v50 }
  0x24   :  { %147 = vmatmul.mubr.f32.vlgmr.msra.gmra.mrb[0].mxu0 %v78_v51 }
  0xf7   :  { %v203_v52 = vpop.f32.mrb[0].mxu0 }
  0xf8   :  { %v204_v54 = vpop.f32.mrb[1].mxu0 }
  0xf9   :  { %v205_v55 = vadd.f32 %v204_v54, %v203_v52 }
  0xfb   :  { %v149_v56 = vadd.f32 %v205_v55, %v170_v53 }
  0xfd   :  { %153 = vst.msk [vmem:[#allocation2] sm:$0xff] %vm152_vm0, %v149_v56 }
  0xfe   :  { %158 = vsyncadd [#allocation3], 96  ;;  %s270_s27 = smov [#allocation2]  }
  0xff   :  { %s159_s28 = sshll.u32 %s270_s27, 4  ;;  %s160_s28 = int_to_ptr.vmem [resolvable:$true] %s159_s28 }
 0x100   :  { %s246_s1 = scalar_lea.vmem %s160_s28, 32  ;;  %s250_s29 = scalar_lea.vmem %s160_s28, 128 }
 0x101   :  { %p247_p0 = scmp.ne.s32.totalorder %s160_s28, %s246_s1  ;;  %p251_p1 = scmp.lt.s32.totalorder %s160_s28, %s160_s28 }
 0x102   :  { %p252_p2 = scmp.lt.s32.totalorder %s250_s29, %s246_s1 }
 0x104   :  { %p253_p3 = por %p252_p2, %p251_p1 }
 0x106   :  { %p254_p4 = pnand %p253_p3, %p247_p0 }
 0x108   :  { %257 = shalt.err (!%p254_p4)
}
 0x109   :  { %s258_s2 = scalar_lea.hbm %s413_s3, 32 }
 0x10a   :  { %p259_p5 = scmp.ne.s32.totalorder %s413_s3, %s258_s2  ;;  %p262_p6 = scmp.lt.u32.totalorder %s258_s2, %s413_s3 }
 0x10c   :  { %p264_p7 = pnand %p262_p6, %p259_p5 }
 0x10e   :  { %267 = shalt.err (!%p264_p7)
}
 0x10f   :  { %s271_s8 = smov 32   ;;  %s272_s9 = smov 2  }
 0x110   :  { %165 = dma.vmem_to_hbm [thread:$0]  %s160_s28, 32, %s413_s3, [#allocation3], %s271_s8, %s271_s8, %s272_s9  }
 0x111   :  { %268 = dma.done.wait [#allocation3], 128  }
 0x112   :  { %269 = vsyncadd [#allocation3], 4294967168 }
 0x113   :  { %169 = vsyncpa [#allocation3], 1 }

</bundles_post_ra>
